<compile_context>
chip_gen: v7x
topology: tpu7x:2x2x1
jax: 0.10.0
libtpu: 0.0.40
codegen_flags: <defaults>
</compile_context>

<pallas_src>
import functools

import jax
import jax.numpy as jnp
from jax.experimental import pallas as pl
from jax.experimental.pallas import tpu as pltpu


def _cdiv(a, b):
    return -(-a // b)


def _round_up(a, m):
    return _cdiv(a, m) * m


def residual_kernel(alpha_ref, beta_ref, x_ref, w_ref, b_ref, o_ref, *, eps):
    # x_ref: (TR, D) tile of rows; w_ref: (D, D) bf16; b_ref: (1, D) f32.
    x = x_ref[...].astype(jnp.float32)
    d = x.shape[-1]

    # --- LayerNormalization (torch.std is unbiased: ddof = 1) ---
    mean = jnp.mean(x, axis=-1, keepdims=True)
    centered = x - mean
    var_unbiased = jnp.sum(centered * centered, axis=-1, keepdims=True) * (
        1.0 / (d - 1)
    )
    std = jnp.sqrt(var_unbiased)
    # EUP reciprocal instead of a VALU divide (only a (TR, 1) vector); fold
    # the scalar alpha into the inverse-std so the per-element work is one FMA.
    inv = pl.reciprocal(std + eps, approx=True)          # (TR, 1)
    scale = alpha_ref[0] * inv                           # (TR, 1)
    normed = centered * scale + beta_ref[0]              # fused mul-add

    # --- sub_layer: Linear(D -> D) on the MXU (bf16 inputs, f32 accumulation) ---
    sub = (
        jnp.dot(
            normed.astype(jnp.bfloat16),
            w_ref[...],
            preferred_element_type=jnp.float32,
        )
        + b_ref[...]
    )

    # --- dropout (eval mode => identity) + residual add ---
    o_ref[...] = (x + sub).astype(o_ref.dtype)


def prepare_params(w, b, alpha, beta):
    """One-time (init-time) parameter preparation.

    Keeps the per-call hot path free of the D^2 bf16 cast / bias reshape
    (a separate XLA op reading+writing ~6 bytes/element of HBM per call).
    """
    D = w.shape[0]
    return (
        w.astype(jnp.bfloat16),                 # (D, D) — resident in VMEM
        b.astype(jnp.float32).reshape(1, D),    # (1, D)
        alpha.astype(jnp.float32),              # (1,)  scalar LN gain
        beta.astype(jnp.float32),               # (1,)  scalar LN bias
    )


def residual_forward(
    x,
    params,
    *,
    eps=1e-6,
    row_tile=2048,
    vmem_limit_bytes=32 * 1024 * 1024,
):
    """x: (B, S, D); params = prepare_params(w, b, alpha, beta)."""
    w_bf16, b2, alpha, beta = params
    B, S, D = x.shape
    assert D >= 2, "unbiased std needs d_model >= 2"
    assert w_bf16.shape == (D, D) and b2.shape == (1, D)
    R = B * S

    itemsize = jnp.dtype(x.dtype).itemsize
    # Sublane packing: 8 rows per vreg for f32, 16 for bf16, 32 for 8-bit.
    row_mult = max(8, 32 // itemsize)

    # --- VMEM budget: double-buffered x + out tiles, resident W/b, f32 temps.
    w_bytes = 2 * (D * D * 2)          # bf16 W, double-buffered by the pipeline
    b_bytes = 2 * (D * 4)
    budget = int(vmem_limit_bytes * 0.75) - w_bytes - b_bytes
    per_row = D * (4 * itemsize + 4 * 4)   # 2x(x)+2x(out) bufs + ~4 f32 temporaries
    tr_vmem_cap = max(row_mult, (max(budget, 0) // per_row) // row_mult * row_mult)

    # --- Row tile: as large as requested / VMEM allows / problem provides.
    tr = min(row_tile, tr_vmem_cap, _round_up(R, row_mult))
    tr = max(row_mult, (tr // row_mult) * row_mult)
    n_tiles = _cdiv(R, tr)

    # v7x megacore: prefer >= 2 and an even number of grid steps so the
    # "parallel" axis gives both TensorCores equal work (best effort).
    if R >= 2 * row_mult and (n_tiles < 2 or n_tiles % 2 == 1):
        target = max(2, n_tiles + (n_tiles % 2))
        tr = max(row_mult, _round_up(_cdiv(R, target), row_mult))
        n_tiles = _cdiv(R, tr)

    R_pad = n_tiles * tr
    x2 = x.reshape(R, D)
    if R_pad != R:
        # Zero-padded rows are harmless (std + eps > 0; results sliced off).
        x2 = jnp.pad(x2, ((0, R_pad - R), (0, 0)))

    kernel = functools.partial(residual_kernel, eps=eps)

    out = pl.pallas_call(
        kernel,
        out_shape=jax.ShapeDtypeStruct((R_pad, D), x.dtype),
        grid_spec=pltpu.PrefetchScalarGridSpec(
            num_scalar_prefetch=0,
            grid=(n_tiles,),
            in_specs=[
                pl.BlockSpec(memory_space=pltpu.MemorySpace.SMEM),  # alpha (1,)
                pl.BlockSpec(memory_space=pltpu.MemorySpace.SMEM),  # beta  (1,)
                pl.BlockSpec((tr, D), lambda i: (i, 0)),            # x rows
                pl.BlockSpec((D, D), lambda i: (0, 0)),             # W bf16, resident
                pl.BlockSpec((1, D), lambda i: (0, 0)),             # b f32, resident
            ],
            out_specs=pl.BlockSpec((tr, D), lambda i: (i, 0)),
        ),
        compiler_params=pltpu.CompilerParams(
            dimension_semantics=("parallel",),
            vmem_limit_bytes=vmem_limit_bytes,
        ),
    )(alpha, beta, x2, w_bf16, b2)
    return out[:R].reshape(B, S, D)


def residual_reference(x, w, b, alpha, beta, *, eps=1e-6):
    """Pure-JAX reference mirroring the PyTorch module (eval-mode dropout)."""
    xf = x.astype(jnp.float32)
    mean = jnp.mean(xf, axis=-1, keepdims=True)
    std = jnp.sqrt(
        jnp.sum((xf - mean) ** 2, axis=-1, keepdims=True) / (xf.shape[-1] - 1)
    )
    normed = alpha[0] * (xf - mean) / (std + eps) + beta[0]
    sub = normed @ w.astype(jnp.float32) + b.astype(jnp.float32)
    return (xf + sub).astype(x.dtype)


if __name__ == "__main__":
    key = jax.random.PRNGKey(0)
    kx, kw, kb, kx2 = jax.random.split(key, 4)

    # d_model = 128: lane-dense output (one full vreg lane width).
    B, S, D = 2, 8, 128
    x = jax.random.normal(kx, (B, S, D), dtype=jnp.float32)
    # Deterministic sub_layer (Linear) parameters.
    w = jax.random.normal(kw, (D, D), dtype=jnp.float32) * (1.0 / jnp.sqrt(D))
    b = jax.random.normal(kb, (D,), dtype=jnp.float32) * 0.01
    # LayerNormalization parameters: alpha = ones(1), bias = zeros(1).
    alpha = jnp.ones((1,), dtype=jnp.float32)
    beta = jnp.zeros((1,), dtype=jnp.float32)

    # One-time parameter prep (bf16 W, reshaped bias) — out of the hot path.
    params = prepare_params(w, b, alpha, beta)

    # 1) Small multi-tile run (row_tile=8 => 2 pipelined grid steps).
    out = jax.block_until_ready(residual_forward(x, params, row_tile=8))
    ref = residual_reference(x, w, b, alpha, beta)
    assert out.shape == (B, S, D), out.shape
    # bf16 MXU inputs + approx EUP reciprocal => ~1e-2-level absolute error.
    assert jnp.allclose(out, ref, atol=3e-2, rtol=3e-2), (
        float(jnp.max(jnp.abs(out - ref)))
    )

    # 2) Larger run exercising the default (bandwidth-amortizing) tile choice
    #    and the even-grid split across TensorCores.
    B2, S2 = 4, 512
    x_big = jax.random.normal(kx2, (B2, S2, D), dtype=jnp.float32)
    out_big = jax.block_until_ready(residual_forward(x_big, params))
    ref_big = residual_reference(x_big, w, b, alpha, beta)
    assert out_big.shape == (B2, S2, D), out_big.shape
    assert jnp.allclose(out_big, ref_big, atol=3e-2, rtol=3e-2), (
        float(jnp.max(jnp.abs(out_big - ref_big)))
    )

    print("KERNEL_OK")
</pallas_src>

<mosaic_0001>
module attributes {stable_mosaic.version = 11 : i64} {
  func.func @residual_kernel(%arg0: i32, %arg1: memref<1xf32, #tpu.memory_space<smem>>, %arg2: memref<1xf32, #tpu.memory_space<smem>>, %arg3: memref<8x128xf32, #tpu.memory_space<vmem>>, %arg4: memref<128x128xbf16, #tpu.memory_space<vmem>>, %arg5: memref<1x128xf32, #tpu.memory_space<vmem>>, %arg6: memref<8x128xf32, #tpu.memory_space<vmem>>) attributes {dimension_semantics = [#tpu.dimension_semantics<parallel>], iteration_bounds = array<i64: 2>, scalar_prefetch = 0 : i64, scratch_operands = 0 : i64, tpu.core_type = #tpu.core_type<tc>, window_params = [{transform_indices = @transform_0, window_bounds = array<i64: 1>}, {transform_indices = @transform_1, window_bounds = array<i64: 1>}, {transform_indices = @transform_2, window_bounds = array<i64: 8, 128>}, {pipeline_mode = #tpu.pipeline_mode<synchronous>, transform_indices = @transform_3, window_bounds = array<i64: 128, 128>}, {pipeline_mode = #tpu.pipeline_mode<synchronous>, transform_indices = @transform_4, window_bounds = array<i64: 1, 128>}, {transform_indices = @transform_5, window_bounds = array<i64: 8, 128>}]} {
    %c0 = arith.constant 0 : index
    %c0_0 = arith.constant 0 : index
    %0 = vector.load %arg3[%c0, %c0_0] : memref<8x128xf32, #tpu.memory_space<vmem>>, vector<8x128xf32>
    %cst = arith.constant dense<0.000000e+00> : vector<8xf32>
    %1 = vector.multi_reduction <add>, %0, %cst [1] : vector<8x128xf32> to vector<8xf32>
    %2 = vector.shape_cast %1 : vector<8xf32> to vector<8x1xf32>
    %cst_1 = arith.constant 1.280000e+02 : f32
    %3 = vector.broadcast %cst_1 : f32 to vector<8x1xf32>
    %4 = arith.divf %2, %3 : vector<8x1xf32>
    %5 = vector.broadcast %4 : vector<8x1xf32> to vector<8x128xf32>
    %6 = arith.subf %0, %5 : vector<8x128xf32>
    %7 = arith.mulf %6, %6 : vector<8x128xf32>
    %cst_2 = arith.constant dense<0.000000e+00> : vector<8xf32>
    %8 = vector.multi_reduction <add>, %7, %cst_2 [1] : vector<8x128xf32> to vector<8xf32>
    %9 = vector.shape_cast %8 : vector<8xf32> to vector<8x1xf32>
    %cst_3 = arith.constant 0.00787401571 : f32
    %10 = vector.broadcast %cst_3 : f32 to vector<8x1xf32>
    %11 = arith.mulf %9, %10 : vector<8x1xf32>
    %12 = math.sqrt %11 : vector<8x1xf32>
    %cst_4 = arith.constant 9.99999997E-7 : f32
    %13 = vector.broadcast %cst_4 : f32 to vector<8x1xf32>
    %14 = arith.addf %12, %13 : vector<8x1xf32>
    %15 = tpu.reciprocal %14 {approx = true} : vector<8x1xf32> -> vector<8x1xf32>
    %c0_5 = arith.constant 0 : index
    %16 = memref.load %arg1[%c0_5] : memref<1xf32, #tpu.memory_space<smem>>
    %17 = vector.broadcast %16 : f32 to vector<8x1xf32>
    %18 = arith.mulf %17, %15 : vector<8x1xf32>
    %19 = vector.broadcast %18 : vector<8x1xf32> to vector<8x128xf32>
    %20 = arith.mulf %6, %19 : vector<8x128xf32>
    %c0_6 = arith.constant 0 : index
    %21 = memref.load %arg2[%c0_6] : memref<1xf32, #tpu.memory_space<smem>>
    %22 = vector.broadcast %21 : f32 to vector<8x128xf32>
    %23 = arith.addf %20, %22 : vector<8x128xf32>
    %24 = arith.truncf %23 : vector<8x128xf32> to vector<8x128xbf16>
    %c0_7 = arith.constant 0 : index
    %c0_8 = arith.constant 0 : index
    %25 = vector.load %arg4[%c0_7, %c0_8] : memref<128x128xbf16, #tpu.memory_space<vmem>>, vector<128x128xbf16>
    %cst_9 = arith.constant dense<0.000000e+00> : vector<8x128xf32>
    %26 = tpu.matmul %24, %25, %cst_9 {dimension_numbers = #tpu.dot_dimension_numbers<[1], [0], [0], [1], [0, 0, 1, 1], [], []>} : vector<8x128xbf16>, vector<128x128xbf16>, vector<8x128xf32> -> vector<8x128xf32>
    %c0_10 = arith.constant 0 : index
    %c0_11 = arith.constant 0 : index
    %27 = vector.load %arg5[%c0_10, %c0_11] : memref<1x128xf32, #tpu.memory_space<vmem>>, vector<1x128xf32>
    %28 = vector.broadcast %27 : vector<1x128xf32> to vector<8x128xf32>
    %29 = arith.addf %26, %28 : vector<8x128xf32>
    %30 = arith.addf %0, %29 : vector<8x128xf32>
    %c0_12 = arith.constant 0 : index
    %c0_13 = arith.constant 0 : index
    %31 = vector.load %arg6[%c0_12, %c0_13] : memref<8x128xf32, #tpu.memory_space<vmem>>, vector<8x128xf32>
    tpu.vector_store %arg6[%c0_12, %c0_13], %30 {strides = array<i32>} : memref<8x128xf32, #tpu.memory_space<vmem>>, vector<8x128xf32>,
    return
  }
  func.func @transform_0(%arg0: i32) -> i32 {
    %c0_i32 = arith.constant 0 : i32
    %c0_i32_0 = arith.constant 0 : i32
    return %c0_i32 : i32
  }
  func.func @transform_1(%arg0: i32) -> i32 {
    %c0_i32 = arith.constant 0 : i32
    %c0_i32_0 = arith.constant 0 : i32
    return %c0_i32 : i32
  }
  func.func @transform_2(%arg0: i32) -> (i32, i32) {
    %c0_i32 = arith.constant 0 : i32
    %c0_i32_0 = arith.constant 0 : i32
    return %arg0, %c0_i32 : i32, i32
  }
  func.func @transform_3(%arg0: i32) -> (i32, i32) {
    %c0_i32 = arith.constant 0 : i32
    %c0_i32_0 = arith.constant 0 : i32
    %c0_i32_1 = arith.constant 0 : i32
    return %c0_i32, %c0_i32_0 : i32, i32
  }
  func.func @transform_4(%arg0: i32) -> (i32, i32) {
    %c0_i32 = arith.constant 0 : i32
    %c0_i32_0 = arith.constant 0 : i32
    %c0_i32_1 = arith.constant 0 : i32
    return %c0_i32, %c0_i32_0 : i32, i32
  }
  func.func @transform_5(%arg0: i32) -> (i32, i32) {
    %c0_i32 = arith.constant 0 : i32
    %c0_i32_0 = arith.constant 0 : i32
    return %arg0, %c0_i32 : i32, i32
  }
}

</mosaic_0001>

<bundles_post_ra>
// kernel: tpu_custom_call.1
= control target key start
LH: loop header
LB: loop body
LE: loop exit
PB: predicated region body
PF: predicated region fallthrough
CT: control target
= control target key end

     0   :  { %s998_s0 = inlined_call_operand.<no memory space> [shape: f32[1], index: 0, kind: input, shape index: {}]   ;;  %s999_s1 = inlined_call_operand.<no memory space> [shape: f32[1], index: 1, kind: input, shape index: {}]   ;;  %s1000_s2 = inlined_call_operand.hbm [shape: f32[16,128], index: 2, kind: input, shape index: {}]   ;;  %s1001_s3 = inlined_call_operand.hbm [shape: bf16[128,128], index: 3, kind: input, shape index: {}]   ;;  %s1002_s4 = inlined_call_operand.vmem [shape: f32[1,128], index: 4, kind: input, shape index: {}]   ;;  %s1003_s5 = inlined_call_operand.hbm [shape: f32[16,128], index: 5, kind: output, shape index: {}]  }
   0x1   :  { %10 = sst [smem:[#allocation2]] %s998_s0 }
   0x2   :  { %11 = sst [smem:[#allocation3]] %s999_s1 }
   0x3   :  { %12 = vsyncpa [#allocation5], 0 }
   0x4   :  { %14 = vsyncpa [#allocation5 + $0x1], 0 }
   0x5   :  { %15 = vsyncpa [#allocation8], 0 }
   0x6   :  { %16 = vsyncpa [#allocation6], 0 }
   0x7   :  { %18 = vsyncpa [#allocation6 + $0x1], 0  ;;  %s790_s22 = smov 0   ;;  %s792_s23 = smov 0  }
   0x8   :  { %s794_s24 = smov 0   ;;  %s796_s25 = smov 0  }
   0x9 LB: > { %s811_s0 = sadd.s32 4294967295, %s745_s25   ;;  %s492_s1 = sadd.s32 4294967294, %s745_s25   ;;  %s745_s25 = sphi %s796_s25, %s1023_s25   ;;  %s741_s24 = sphi %s794_s24, %s1022_s24   ;;  %s737_s23 = sphi %s792_s23, %s1021_s23   ;;  %s733_s22 = sphi %s790_s22, %s1020_s22  }
   0xa   : > { %p86_p0 = scmp.ne.s32.totalorder %s737_s23, %s733_s22  ;;  %p1004_p1 = scmp.eq.s32.totalorder %s811_s0, 0 }
   0xb   : > { %p158_p3 = scmp.eq.s32.totalorder %s492_s1, 1  ;;  %p493_p5 = scmp.ge.s32.totalorder %s745_s25, 1 }
   0xc   : > { %p820_p4 = por %p1004_p1, %p86_p0  ;;  %p165_p7 = scmp.lt.s32.totalorder %s745_s25, 3 }
   0xd   : > { %p825_p6 = por %p158_p3, %p86_p0  ;;  %s747_s29 = smov [#allocation7]  }
   0xe   : > { %s1007_s26 = scalar_select %p820_p4, 1, 0 }
   0xf   : > { %s1008_s27 = scalar_select %p825_p6, 1, 0 }
  0x10   : > { %p830_p8 = pnand %p493_p5, %p165_p7  ;;  %s183_s30 = sshll.u32 %s747_s29, 4  ;;  %s834_s30 = int_to_ptr.vmem [resolvable:$true] %s183_s30 }
  0x11   : > { %s846_s7 = sadd.s32 1, %s745_s25   ;;  %s73_s8 = sadd.s32 1, %s741_s24 }
  0x12   : > { %s1009_s28 = scalar_select %p830_p8, 1, 0 }
  0x13   : > { %p552_p9 = pneg %p830_p8  ;;  %s70_s9 = ssub.s32 %s745_s25, %s846_s7 }
  0x14   : > { %s617_s12 = scalar_lea.hbm %s1001_s3, 1024 }
  0x15   : > { %p841_p11 = pnand %p552_p9, %p1004_p1  ;;  %p618_p12 = scmp.ne.s32.totalorder %s1001_s3, %s617_s12 }
  0x16   : > { %p624_p5 = scmp.lt.u32.totalorder %s617_s12, %s1001_s3 }
  0x17   : > { %p619_p13 = pneg %p841_p11 }
  0x19   : > { %p620_p0 = pnand %p619_p13, %p618_p12 }
  0x1b   : > { %p621_p3 = pneg %p620_p0 }
  0x1d   : > { %p626_p7 = pnand %p624_p5, %p621_p3 }
  0x1f   : > { %629 = shalt.err (!%p626_p7)
}
  0x20   : > { %s630_s17 = scalar_lea.vmem %s834_s30, 1024  ;;  %p638_p2 = scmp.lt.s32.totalorder %s834_s30, %s834_s30 }
  0x21   : > { %p631_p9 = scmp.ne.s32.totalorder %s834_s30, %s630_s17  ;;  %p639_p6 = scmp.lt.s32.totalorder %s630_s17, %s630_s17 }
  0x23   : > { %p633_p10 = pnand %p631_p9, %p619_p13  ;;  %p640_p4 = por %p639_p6, %p638_p2 }
  0x25   : > { %p634_p1 = pneg %p633_p10 }
  0x27   : > { %p641_p8 = pnand %p640_p4, %p634_p1 }
  0x29   : > { %644 = shalt.err (!%p641_p8)
}
  0x2a   : > { %s748_s18 = smov 64   ;;  %s749_s19 = smov 4  }
  0x2b   : > { %555 = dma.hbm_to_vmem [thread:$0]  (!%p841_p11), %s1001_s3, 1024, %s834_s30, [#allocation8], %s748_s18, %s748_s18, %s749_s19  }
  0x2c   : > { %p71_p2 = scmp.eq.s32.totalorder %s70_s9, 0  ;;  %p80_p1 = scmp.ne.s32.totalorder %s741_s24, %s737_s23 }
  0x2d   : > { %p81_p4 = scmp.eq.s32.totalorder %s745_s25, 0  ;;  %p565_p6 = scmp.lt.s32.totalorder %s745_s25, 2 }
  0x2e   : > { %s877_s1 = scalar_select %p71_p2, %s741_s24, %s73_s8  }
  0x2f   : > { %p82_p8 = por %p81_p4, %p80_p1  ;;  %p1011_p10 = scmp.eq.s32.totalorder %s811_s0, 1 }
  0x30   : > { %s200_s10 = sand.u32 1, %s741_s24   ;;  %s497_s11 = sshll.u32 %s745_s25, 7 }
  0x31   : > { %p881_p12 = por %p1011_p10, %p80_p1  ;;  %s496_s12 = sshll.u32 %s200_s10, 3 }
  0x32   : > { %s890_s14 = scalar_lea.hbm %s1000_s2, %s497_s11  ;;  %s204_s30 = scalar_lea.vmem [#allocation4], %s496_s12 }
  0x33   : > { %s211_s8 = sshll.u32 %s204_s30, 4  ;;  %p892_p11 = pnand %p565_p6, %p82_p8  ;;  %s896_s8 = int_to_ptr.vmem [resolvable:$true] %s211_s8 }
  0x34   : > { %s201_s15 = scalar_lea.sflag [#allocation5], %s200_s10  ;;  %s645_s16 = scalar_lea.hbm %s890_s14, 128 }
  0x35   : > { %p646_p13 = scmp.ne.s32.totalorder %s890_s14, %s645_s16  ;;  %p647_p0 = pneg %p892_p11 }
  0x36   : > { %s650_s19 = scalar_lea.hbm %s1000_s2, 256  ;;  %p651_p7 = scmp.lt.u32.totalorder %s890_s14, %s1000_s2 }
  0x37   : > { %p648_p3 = pnand %p647_p0, %p646_p13  ;;  %p652_p9 = scmp.lt.u32.totalorder %s650_s19, %s645_s16 }
  0x38   : > { %p654_p1 = scmp.lt.u32.totalorder %s645_s16, %s890_s14 }
  0x39   : > { %p649_p5 = pneg %p648_p3  ;;  %p653_p2 = por %p652_p9, %p651_p7 }
  0x3b   : > { %p655_p4 = por %p654_p1, %p653_p2 }
  0x3d   : > { %p656_p6 = pnand %p655_p4, %p649_p5 }
  0x3f   : > { %659 = shalt.err (!%p656_p6)
}
  0x40   : > { %s660_s10 = scalar_lea.vmem %s896_s8, 128  ;;  %s750_s11 = smov [#allocation4]  }
  0x41   : > { %p661_p8 = scmp.ne.s32.totalorder %s896_s8, %s660_s10  ;;  %s665_s12 = sshll.u32 %s750_s11, 4  ;;  %s666_s12 = int_to_ptr.vmem [resolvable:$false] %s665_s12 }
  0x42   : > { %s667_s6 = scalar_lea.vmem %s666_s12, 256  ;;  %p668_p3 = scmp.lt.s32.totalorder %s896_s8, %s666_s12 }
  0x43   : > { %p663_p10 = pnand %p661_p8, %p647_p0  ;;  %p669_p7 = scmp.lt.s32.totalorder %s667_s6, %s660_s10 }
  0x45   : > { %p664_p13 = pneg %p663_p10  ;;  %p670_p9 = por %p669_p7, %p668_p3 }
  0x47   : > { %p671_p2 = pnand %p670_p9, %p664_p13 }
  0x49   : > { %674 = shalt.err (!%p671_p2)
}
  0x4a   : > { %559 = dma.hbm_to_vmem [thread:$0]  (!%p892_p11), %s890_s14, 128, %s896_s8, %s201_s15  }
  0x4b   : > { %p1014_p5 = scmp.ne.s32.totalorder %s1009_s28, 0 }
  0x4c   : > { %s926_s13 = sand.u32 (!%p1014_p5), 1, %s737_s23   ;;  %p1015_p0 = scmp.ne.s32.totalorder (!%p1014_p5), %s1007_s26, 0 }
  0x4d   : > { %220 = sbr.rel (%p1014_p5) target bundleno = 647 (0x287), region = 40  ;;  %s499_s30 = sshll.u32 (!%p1014_p5), %s926_s13, 3 }
  0x4e   : > { %s223_s16 = scalar_lea.sflag (!%p1014_p5), [#allocation5], %s926_s13  ;;  %s226_s17 = scalar_lea.vmem (!%p1014_p5), [#allocation4], %s499_s30 }
  0x54   : > { %720 = dma.done.wait (%p1015_p0), %s223_s16, 128  }
  0x55   : > { %722 = vsyncadd (%p1015_p0), %s223_s16, 4294967168  ;;  %p1016_p11 = scmp.eq.s32.totalorder %s811_s0, 0 }
  0x57   : > { %724 = dma.done.wait (%p1016_p11), [#allocation8], 1024   ;;  %p1017_p1 = pmov %p1016_p11 }
  0x58   : > { %v940_v0 = vld [vmem:[%s226_s17] sm:$0xff]  ;;  %v605_v5 = vld [vmem:[#allocation7] sm:$0xff]   ;;  %v751_v6 = vmov 0.0   ;;  %v606_v7 = vld [vmem:[#allocation7 + $0x8] sm:$0xff]   ;;  %vm752_vm0 = vmmov 0   ;;  %s277_s26 = sld [smem:[#allocation2]] }
  0x59   : > { %726 = vsyncadd (%p1017_p1), [#allocation8], 4294966272  ;;  %259 = vadd.xlane.f32.xlu0 %v940_v0  ;;  %524 = vmatprep.subr.bf16.mxu0 %v751_v6  ;;  %v607_v8 = vld [vmem:[#allocation7 + $0x10] sm:$0xff]   ;;  %v608_v9 = vld [vmem:[#allocation7 + $0x18] sm:$0xff]   ;;  %s281_s28 = sld [smem:[#allocation3]]  ;;  %s512_s9 = sshll.u32 %s811_s0, 7 }
  0x5a   : > { %525 = vmatpush3.bf16.msra.mxu0 %v605_v5  ;;  %540 = vmatprep.mubr.msk.bf16.mxu0 %vm752_vm0, %v751_v6  ;;  %v609_v10 = vld [vmem:[#allocation7 + $0x20] sm:$0xff]   ;;  %v610_v11 = vld [vmem:[#allocation7 + $0x28] sm:$0xff]   ;;  %v611_v12 = vld [vmem:[#allocation7 + $0x30] sm:$0xff]   ;;  %s256_s15 = scalar_lea.vmem [#allocation9], %s499_s30  ;;  %s954_s21 = scalar_lea.hbm %s1003_s5, %s512_s9 }
  0x5b   : > { %526 = vmatprep.subr.bf16.mxu0 %v751_v6  ;;  %v612_v13 = vld [vmem:[#allocation7 + $0x38] sm:$0xff]   ;;  %v502_v29 = vld [vmem:[%s1002_s4] ss:$0 sm:$0xff]  ;;  %s412_s18 = sshll.u32 %s256_s15, 4  ;;  %s399_s0 = scalar_lea.sflag [#allocation6], %s926_s13  ;;  %s956_s18 = int_to_ptr.vmem [resolvable:$true] %s412_s18 }
  0x5c   : > { %s675_s10 = scalar_lea.vmem %s956_s18, 128  ;;  %s753_s11 = smov [#allocation9]  }
  0x5d   : > { %p676_p4 = scmp.ne.s32.totalorder %s956_s18, %s675_s10  ;;  %s679_s12 = sshll.u32 %s753_s11, 4  ;;  %s680_s12 = int_to_ptr.vmem [resolvable:$false] %s679_s12 }
  0x5e   : > { %527 = vmatpush3.bf16.msra.mxu0 %v606_v7  ;;  %v278_v22 = vstv %s277_s26  ;;  %s681_s6 = scalar_lea.vmem %s680_s12, 256  ;;  %p682_p10 = scmp.lt.s32.totalorder %s956_s18, %s680_s12 }
  0x5f   : > { %528 = vmatprep.subr.bf16.mxu0 %v751_v6  ;;  %v282_v25 = vstv %s281_s28  ;;  %p677_p6 = pnand %p676_p4, %p881_p12  ;;  %p683_p13 = scmp.lt.s32.totalorder %s681_s6, %s675_s10 }
  0x61   : > { %p678_p8 = pneg %p677_p6  ;;  %p684_p3 = por %p683_p13, %p682_p10 }
  0x62   : > { %529 = vmatpush3.bf16.msra.mxu0 %v607_v8 }
  0x63   : > { %530 = vmatprep.subr.bf16.mxu0 %v751_v6  ;;  %p685_p7 = pnand %p684_p3, %p678_p8 }
  0x66   : > { %531 = vmatpush3.bf16.msra.mxu0 %v608_v9 }
  0x67   : > { %532 = vmatprep.subr.bf16.mxu0 %v751_v6 }
  0x6a   : > { %533 = vmatpush3.bf16.msra.mxu0 %v609_v10 }
  0x6b   : > { %534 = vmatprep.subr.bf16.mxu0 %v751_v6 }
  0x6e   : > { %535 = vmatpush3.bf16.msra.mxu0 %v610_v11 }
  0x6f   : > { %536 = vmatprep.subr.bf16.mxu0 %v751_v6 }
  0x72   : > { %537 = vmatpush3.bf16.msra.mxu0 %v611_v12 }
  0x73   : > { %538 = vmatprep.subr.bf16.mxu0 %v751_v6 }
  0x76   : > { %539 = vmatpush3.bf16.msra.mxu0 %v612_v13 }
  0xe6   : > { %v260_v1 = vpop.xlane.xlu0 %259 }
  0xe7   : > { %v262_v2 = vmul.f32 0.0078125, %v260_v1 }
  0xe9   : > { %v263_v3 = vsub.f32 %v940_v0, %v262_v2 }
  0xeb   : > { %v264_v4 = vmul.f32 %v263_v3, %v263_v3 }
  0xed   : > { %265 = vadd.xlane.f32.xlu0 %v264_v4 }
 0x17a   : > { %v266_v14 = vpop.xlane.xlu0 %265 }
 0x17b   : > { %v267_v15 = vmul.f32 0.007874016, %v266_v14 }
 0x17d   : > { %613 = vrsqrt.f32 %v267_v15  ;;  %vm270_vm1 = vcmp.eq.f32.partialorder %v267_v15, inf  ;;  %v273_v18 = vand.u32 2147483648, %v267_v15  ;;  %vm272_vm2 = vcmp.eq.f32.partialorder %v267_v15, 0.0 }
 0x187   : > { %v614_v16 = vpop.eup %613 }
 0x188   : > { %v269_v17 = vmul.f32 %v614_v16, %v267_v15 }
 0x18a   : > { %v271_v19 = vsel %vm270_vm1, %v267_v15, %v269_v17 }
 0x18b   : > { %v274_v20 = vsel %vm272_vm2, %v273_v18, %v271_v19 }
 0x18c   : > { %v275_v21 = vadd.f32 1e-06, %v274_v20 }
 0x18e   : > { %615 = vrcp.f32 %v275_v21 }
 0x198   : > { %v616_v23 = vpop.eup %615 }
 0x199   : > { %v279_v24 = vmul.f32 %v616_v23, %v278_v22 }
 0x19b   : > { %v280_v26 = vmul.f32 %v279_v24, %v263_v3 }
 0x19d   : > { %v283_v27 = vadd.f32 %v282_v25, %v280_v26 }
 0x19f   : > { %v284_v28 = vpack.c.bf16 %v283_v27, %v283_v27 }
 0x1a1   : > { %541 = vmatmul.mubr.bf16.vlgmr.msra.gmra.mrb[0].mxu0 %v284_v28 }
 0x274   : > { %v390_v30 = vpop.f32.mrb[0].mxu0 }
 0x275   : > { %v391_v31 = vadd.f32 %v502_v29, %v390_v30  ;;  %v542_v32 = vpop.f32.mrb[1].mxu0 }
 0x276   : > { %v393_v33 = vpop.f32.mrb[2].mxu0 }
 0x277   : > { %v396_v34 = vadd.f32 %v391_v31, %v940_v0  ;;  %v543_v35 = vpop.f32.mrb[3].mxu0 }
 0x279   : > { %397 = vst [vmem:[%s256_s15] sm:$0xff] %v396_v34 }
 0x27a   : > { %688 = shalt.err (!%p685_p7)
}
 0x27b   : > { %s689_s13 = scalar_lea.hbm %s954_s21, 128  ;;  %s693_s17 = scalar_lea.hbm %s1003_s5, 256 }
 0x27c   : > { %p690_p9 = scmp.ne.s32.totalorder %s954_s21, %s689_s13  ;;  %p694_p0 = scmp.lt.u32.totalorder %s954_s21, %s1003_s5 }
 0x27d   : > { %p695_p11 = scmp.lt.u32.totalorder %s693_s17, %s689_s13  ;;  %p697_p4 = scmp.lt.u32.totalorder %s689_s13, %s954_s21 }
 0x27e   : > { %p691_p2 = pnand %p690_p9, %p881_p12 }
 0x27f   : > { %p696_p1 = por %p695_p11, %p694_p0 }
 0x280   : > { %p692_p5 = pneg %p691_p2 }
 0x281   : > { %p698_p6 = por %p697_p4, %p696_p1 }
 0x283   : > { %p699_p8 = pnand %p698_p6, %p692_p5 }
 0x285   : > { %702 = shalt.err (!%p699_p8)
}
 0x286   : > { %550 = dma.vmem_to_hbm [thread:$0]  (%p881_p12), %s956_s18, 128, %s954_s21, %s399_s0  }
 0x287 PF: > { %s424_s14 = sand.u32 1, %s733_s22   ;;  %p1018_p10 = scmp.ne.s32.totalorder %s1008_s27, 0 }
 0x288   : > { %p1019_p13 = scmp.ge.s32.totalorder %s745_s25, 2  ;;  %s425_s8 = scalar_lea.sflag [#allocation6], %s424_s14 }
 0x28a   : > { %p561_p3 = pnand %p1019_p13, %p1018_p10 }
 0x28c   : > { %728 = dma.done.wait (!%p561_p3), %s425_s8, 128  }
 0x28d   : > { %730 = vsyncadd (!%p561_p3), %s425_s8, 4294967168  ;;  %p21_p7 = scmp.ge.s32.totalorder %s846_s7, 4   ;;  %s1020_s22 = smov %s737_s23 }
 0x28e   : > { %s1021_s23 = smov %s741_s24  ;;  %s1022_s24 = smov %s877_s1 }
 0x28f   : > { %s1023_s25 = smov %s846_s7  ;;  %23 = sbr.rel (!%p21_p7) target bundleno = 9 (0x9), region = 89 }
 0x296   :  { %430 = vsyncpa [#allocation5], 1 }
 0x297   :  { %432 = vsyncpa [#allocation5 + $0x1], 1 }
 0x298   :  { %433 = vsyncpa [#allocation8], 1 }
 0x299   :  { %434 = vsyncpa [#allocation6], 1 }
 0x29a   :  { %436 = vsyncpa [#allocation6 + $0x1], 1 }

</bundles_post_ra>
